<compile_context>
chip_gen: v7x
topology: tpu7x:2x2x1
jax: 0.10.0
libtpu: 0.0.40
codegen_flags: <defaults>
</compile_context>

<pallas_src>
import functools
import math

import jax
import jax.numpy as jnp
from jax.experimental import pallas as pl
from jax.experimental.pallas import tpu as pltpu


# ----------------------------------------------------------------------------
# Small static helpers
# ----------------------------------------------------------------------------
def _pad8(c):
    """Pad a channel count up to a multiple of 8 (f32 sublane tile)."""
    return ((c + 7) // 8) * 8


def _lane_pad(n):
    """Pad a flattened-spatial length up to a multiple of 128 (lane width)."""
    return ((n + 127) // 128) * 128


_ROLL_DIR = []


def _get_roll_dir():
    """Resolve pltpu.roll's rotation convention with a tiny one-off kernel.

    Returns d such that pltpu.roll(x, (d*o) % n, axis=-1)[..., i] equals
    x[..., (i + o) % n].  Must be called once outside jit (result is cached).
    """
    if not _ROLL_DIR:
        def k(x_ref, o_ref):
            o_ref[...] = pltpu.roll(x_ref[...], 3, 1)

        x = jnp.tile(jnp.arange(128, dtype=jnp.float32)[None, :], (8, 1))
        y = pl.pallas_call(
            k, out_shape=jax.ShapeDtypeStruct((8, 128), jnp.float32))(x)
        if bool(jnp.array_equal(y, jnp.roll(x, 3, axis=1))):
            _ROLL_DIR.append(-1)          # pltpu.roll matches jnp.roll
        elif bool(jnp.array_equal(y, jnp.roll(x, -3, axis=1))):
            _ROLL_DIR.append(1)
        else:
            raise RuntimeError("unexpected pltpu.roll semantics")
    return _ROLL_DIR[0]


# ----------------------------------------------------------------------------
# Parameter pre-transformation (wrapper-side, plain XLA ops)
# ----------------------------------------------------------------------------
def _prep_bn(bn, cp):
    """(scale, shift) vectors of length C -> zero-padded (cp, 1) f32 columns."""
    scale, shift = bn
    c = scale.shape[0]
    s = jnp.zeros((cp, 1), jnp.float32).at[:c, 0].set(scale)
    b = jnp.zeros((cp, 1), jnp.float32).at[:c, 0].set(shift)
    return s, b


def _prep_conv3(w_hwio, cin_p, cout_p):
    """(3,3,Cin,Cout) HWIO weight -> (cout_p, 9*cin_p) bf16 im2col matrix.

    Column order is tap-major (dy, dx), channel-minor -- matching the kernel's
    patch layout.  Padded channels / outputs get zero weights."""
    kh, kw, cin, cout = w_hwio.shape
    wp = jnp.zeros((kh, kw, cin_p, cout_p), jnp.float32)
    wp = wp.at[:, :, :cin, :cout].set(w_hwio)
    return wp.reshape(kh * kw * cin_p, cout_p).T.astype(jnp.bfloat16)


def _prep_conv1x1(w, cin_p, cout_p):
    """(Cin, Cout) 1x1-conv weight -> zero-padded (cout_p, cin_p) bf16 matrix."""
    cin, cout = w.shape
    wp = jnp.zeros((cin_p, cout_p), jnp.float32).at[:cin, :cout].set(w)
    return wp.T.astype(jnp.bfloat16)


def _pool_matrix(H, W, in_width, out_width):
    """Constant (in_width, out_width) bf16 matrix implementing 2x2 avg pool."""
    r = jnp.arange(H * W)
    q = (r // W // 2) * (W // 2) + (r % W) // 2
    P = (q[:, None] == jnp.arange((H // 2) * (W // 2))[None, :])
    P = P.astype(jnp.float32) * 0.25
    P = jnp.pad(P, ((0, in_width - H * W),
                    (0, out_width - (H // 2) * (W // 2))))
    return P.astype(jnp.bfloat16)


def _broadcast_spec(shape):
    """BlockSpec for a weight that is identical for every grid step."""
    zeros = (0,) * len(shape)
    return pl.BlockSpec(shape, lambda n, zeros=zeros: zeros)


# ----------------------------------------------------------------------------
# Plan builder: walk the DenseNet structure once (static) and emit
#   * a flat list of pre-transformed weight arrays (kernel inputs)
#   * a list of static op descriptors interpreted (unrolled) by the kernel body
#   * VMEM slab shapes for the per-stage feature maps
# ----------------------------------------------------------------------------
def _build_plan(params, H0, W0):
    weights, plan, slab_shapes = [], [], []

    H, W = H0, W0
    hwp = _lane_pad(H * W)

    w1 = params["conv1"]                             # (3, 3, 3, C0) HWIO
    in_c, C0 = w1.shape[2], w1.shape[3]
    in_pad, c0p = _pad8(in_c), _pad8(C0)
    weights.append(_prep_conv3(w1, in_pad, c0p))
    plan.append(dict(kind="conv1", stage=0, H=H, W=W, coutp=c0p))
    cin = C0

    stage = 0
    for block, trans in (("dense1", "trans1"),
                         ("dense2", "trans2"),
                         ("dense3", None)):
        for lp in params[block]:
            cp = _pad8(cin)
            if "w2" in lp:                           # Bottleneck layer
                inter = lp["w1"].shape[1]
                ip = _pad8(inter)
                g = lp["w2"].shape[3]
                s1, b1 = _prep_bn(lp["bn1"], cp)
                s2, b2 = _prep_bn(lp["bn2"], ip)
                weights.extend([s1, b1, _prep_conv1x1(lp["w1"], cp, ip),
                                s2, b2, _prep_conv3(lp["w2"], ip, g)])
                plan.append(dict(kind="bottleneck", stage=stage, H=H, W=W,
                                 cin=cin, cp=cp, g=g))
            else:                                    # SingleLayer
                g = lp["w1"].shape[3]
                s1, b1 = _prep_bn(lp["bn1"], cp)
                weights.extend([s1, b1, _prep_conv3(lp["w1"], cp, g)])
                plan.append(dict(kind="single", stage=stage, H=H, W=W,
                                 cin=cin, cp=cp, g=g))
            cin += g
        slab_shapes.append((_pad8(cin), hwp))

        if trans is not None:
            tp = params[trans]
            nOut = tp["w"].shape[1]
            sp, outp = _pad8(cin), _pad8(nOut)
            s, b = _prep_bn(tp["bn"], sp)
            hwp_out = _lane_pad((H // 2) * (W // 2))
            weights.extend([s, b, _prep_conv1x1(tp["w"], sp, outp),
                            _pool_matrix(H, W, hwp, hwp_out)])
            plan.append(dict(kind="transition", stage_in=stage,
                             stage_out=stage + 1, outp=outp))
            cin, H, W, hwp = nOut, H // 2, W // 2, hwp_out
            stage += 1

    # Head: BN+ReLU + global avg pool + Linear + log_softmax.
    sp = _pad8(cin)
    ncls = params["fc_w"].shape[1]
    s, b = _prep_bn(params["bn_final"], sp)
    fw = jnp.zeros((sp, ncls), jnp.float32).at[:cin, :].set(params["fc_w"])
    weights.extend([s, b, fw.T.astype(jnp.bfloat16),
                    params["fc_b"].astype(jnp.float32).reshape(ncls, 1)])
    plan.append(dict(kind="head", stage=stage, hw=H * W))

    return plan, weights, slab_shapes, in_pad


# ----------------------------------------------------------------------------
# In-kernel building blocks
# ----------------------------------------------------------------------------
def _bn_relu(x, s_ref, b_ref):
    return jnp.maximum(x * s_ref[...] + b_ref[...], 0.0)


def _conv3x3_im2col(act, w_mat, H, W, roll_dir):
    """3x3 / pad=1 conv as ONE im2col matmul in the (C, H*W) layout.

    act   : (Cp, HWp) float32  -- channels on sublanes, flat spatial on lanes.
    w_mat : (Cout, 9*Cp) bfloat16 (tap-major, channel-minor columns).
    Returns (Cout, HWp) float32.  Lane-padding columns (>= H*W) carry junk that
    is never read by any valid output position."""
    cp, hwp = act.shape
    idx = jax.lax.broadcasted_iota(jnp.int32, (1, hwp), 1)
    row = idx // W
    col = idx % W
    taps = []
    for dy in (-1, 0, 1):
        for dx in (-1, 0, 1):
            off = dy * W + dx
            if off == 0:
                src = act
            else:
                src = pltpu.roll(act, (roll_dir * off) % hwp, 1)
            ok = ((row + dy >= 0) & (row + dy < H) &
                  (col + dx >= 0) & (col + dx < W))
            taps.append(jnp.where(ok, src, 0.0))
    patch = jnp.concatenate(taps, axis=0)                    # (9*Cp, HWp) f32
    return jnp.dot(w_mat, patch.astype(jnp.bfloat16),
                   preferred_element_type=jnp.float32)


def _make_kernel(plan, n_weights, roll_dir):
    """Build the fused per-sample kernel body (plan is unrolled at trace time)."""

    def kernel(*args):
        x_ref = args[0]
        wrefs = args[1:1 + n_weights]
        out_ref = args[1 + n_weights]
        slabs = args[2 + n_weights:]

        # Per-sample re-init: padded / not-yet-written channel rows must read
        # as exact zeros (they are multiplied by zero-padded weights anyway).
        for sl in slabs:
            sl[...] = jnp.zeros(sl.shape, sl.dtype)

        pos = [0]

        def nxt():
            r = wrefs[pos[0]]
            pos[0] += 1
            return r

        for op in plan:
            kind = op["kind"]
            if kind == "conv1":
                w = nxt()
                y = _conv3x3_im2col(x_ref[0], w[...], op["H"], op["W"], roll_dir)
                slabs[op["stage"]][0:op["coutp"], :] = y

            elif kind == "single":
                s, b, w = nxt(), nxt(), nxt()
                sl = slabs[op["stage"]]
                act = _bn_relu(sl[0:op["cp"], :], s, b)
                y = _conv3x3_im2col(act, w[...], op["H"], op["W"], roll_dir)
                sl[op["cin"]:op["cin"] + op["g"], :] = y

            elif kind == "bottleneck":
                s1, b1, w1 = nxt(), nxt(), nxt()
                s2, b2, w2 = nxt(), nxt(), nxt()
                sl = slabs[op["stage"]]
                act = _bn_relu(sl[0:op["cp"], :], s1, b1)
                t = jnp.dot(w1[...], act.astype(jnp.bfloat16),
                            preferred_element_type=jnp.float32)   # (ip, HWp)
                act2 = _bn_relu(t, s2, b2)
                y = _conv3x3_im2col(act2, w2[...], op["H"], op["W"], roll_dir)
                sl[op["cin"]:op["cin"] + op["g"], :] = y

            elif kind == "transition":
                s, b, w, pmat = nxt(), nxt(), nxt(), nxt()
                sl_in = slabs[op["stage_in"]]
                sl_out = slabs[op["stage_out"]]
                act = _bn_relu(sl_in[...], s, b)
                y = jnp.dot(w[...], act.astype(jnp.bfloat16),
                            preferred_element_type=jnp.float32)   # (outp, HWp)
                pooled = jnp.dot(y.astype(jnp.bfloat16), pmat[...],
                                 preferred_element_type=jnp.float32)
                sl_out[0:op["outp"], :] = pooled

            else:  # head
                s, b, fw, fb = nxt(), nxt(), nxt(), nxt()
                sl = slabs[op["stage"]]
                act = _bn_relu(sl[...], s, b)                     # (sp, HWp)
                hwp = act.shape[1]
                lane = jax.lax.broadcasted_iota(jnp.int32, (1, hwp), 1)
                act = jnp.where(lane < op["hw"], act, 0.0)
                # FC before global pooling (they commute: pooling is linear).
                t = jnp.dot(fw[...], act.astype(jnp.bfloat16),
                            preferred_element_type=jnp.float32)   # (ncls, HWp)
                logits = (jnp.sum(t, axis=1, keepdims=True) * (1.0 / op["hw"])
                          + fb[...])                              # (ncls, 1)
                m = jnp.max(logits, axis=0, keepdims=True)
                z = logits - m
                lse = jnp.log(jnp.sum(jnp.exp(z), axis=0, keepdims=True))
                out_ref[0] = z - lse

    return kernel


# ----------------------------------------------------------------------------
# Forward pass wrapper (one fused pallas_call for the whole network)
# ----------------------------------------------------------------------------
def densenet_forward(x_nchw, params, bottleneck=False):
    """NCHW input -> (N, nClasses) log-probabilities."""
    del bottleneck                      # layer structure is inferred from params
    N, in_c, H0, W0 = x_nchw.shape
    plan, weights, slab_shapes, in_pad = _build_plan(params, H0, W0)
    ncls = params["fc_w"].shape[1]

    hwp0 = slab_shapes[0][1]
    x = x_nchw.reshape(N, in_c, H0 * W0).astype(jnp.float32)
    x = jnp.pad(x, ((0, 0), (0, in_pad - in_c), (0, hwp0 - H0 * W0)))

    kernel = _make_kernel(plan, len(weights), _get_roll_dir())

    in_specs = [pl.BlockSpec((1, in_pad, hwp0), lambda n: (n, 0, 0))]
    in_specs += [_broadcast_spec(w.shape) for w in weights]

    # NOTE(scale-up): slabs are per-sample and must be re-budgeted against
    # v7x's 64 MiB VMEM for larger resolutions / channel counts.
    out = pl.pallas_call(
        kernel,
        out_shape=jax.ShapeDtypeStruct((N, ncls, 1), jnp.float32),
        grid=(N,),
        in_specs=in_specs,
        out_specs=pl.BlockSpec((1, ncls, 1), lambda n: (n, 0, 0)),
        scratch_shapes=[pltpu.VMEM(s, jnp.float32) for s in slab_shapes],
        compiler_params=pltpu.CompilerParams(
            dimension_semantics=("parallel",)),
    )(x, *weights)
    return out[:, :, 0]


# ----------------------------------------------------------------------------
# Parameters (PyTorch-style init, inference-mode BN folded to scale/shift)
# ----------------------------------------------------------------------------
def make_params(key, growthRate, depth, reduction, nClasses, bottleneck):
    nDenseBlocks = (depth - 4) // 3
    if bottleneck:
        nDenseBlocks //= 2
    nChannels = 2 * growthRate
    keys = iter(jax.random.split(key, 256))

    def conv_w(k, kh, kw, cin, cout):
        std = math.sqrt(2.0 / (kh * kw * cout))       # PyTorch init in __init__
        return jax.random.normal(k, (kh, kw, cin, cout), jnp.float32) * std

    def bn(c):
        gamma = jnp.ones((c,), jnp.float32)
        beta = jnp.zeros((c,), jnp.float32)
        mean = jnp.zeros((c,), jnp.float32)
        var = jnp.ones((c,), jnp.float32)
        scale = gamma / jnp.sqrt(var + 1e-5)
        return scale, beta - mean * scale

    def make_dense(nCh):
        layers = []
        for _ in range(nDenseBlocks):
            if bottleneck:
                inter = 4 * growthRate
                layers.append(dict(
                    bn1=bn(nCh),
                    w1=conv_w(next(keys), 1, 1, nCh, inter).reshape(nCh, inter),
                    bn2=bn(inter),
                    w2=conv_w(next(keys), 3, 3, inter, growthRate)))
            else:
                layers.append(dict(
                    bn1=bn(nCh),
                    w1=conv_w(next(keys), 3, 3, nCh, growthRate)))
            nCh += growthRate
        return layers, nCh

    params = {"conv1": conv_w(next(keys), 3, 3, 3, nChannels)}
    params["dense1"], nChannels = make_dense(nChannels)
    nOut = int(math.floor(nChannels * reduction))
    params["trans1"] = dict(
        bn=bn(nChannels),
        w=conv_w(next(keys), 1, 1, nChannels, nOut).reshape(nChannels, nOut))
    nChannels = nOut
    params["dense2"], nChannels = make_dense(nChannels)
    nOut = int(math.floor(nChannels * reduction))
    params["trans2"] = dict(
        bn=bn(nChannels),
        w=conv_w(next(keys), 1, 1, nChannels, nOut).reshape(nChannels, nOut))
    nChannels = nOut
    params["dense3"], nChannels = make_dense(nChannels)
    params["bn_final"] = bn(nChannels)
    lim = 1.0 / math.sqrt(nChannels)
    params["fc_w"] = jax.random.uniform(next(keys), (nChannels, nClasses),
                                        jnp.float32, -lim, lim)
    params["fc_b"] = jnp.zeros((nClasses,), jnp.float32)
    return params


# ----------------------------------------------------------------------------
# Pure-JAX f32 reference for verification
# ----------------------------------------------------------------------------
def ref_forward(x_nchw, params, bottleneck=False):
    del bottleneck
    x = jnp.transpose(x_nchw, (0, 2, 3, 1)).astype(jnp.float32)
    P = jax.lax.Precision.HIGHEST

    def conv3(x, w):
        return jax.lax.conv_general_dilated(
            x, w, (1, 1), ((1, 1), (1, 1)),
            dimension_numbers=("NHWC", "HWIO", "NHWC"), precision=P)

    def conv1(x, w):
        return jax.lax.conv_general_dilated(
            x, w.reshape(1, 1, *w.shape), (1, 1), "VALID",
            dimension_numbers=("NHWC", "HWIO", "NHWC"), precision=P)

    def bnrelu(x, bn):
        s, b = bn
        return jnp.maximum(x * s + b, 0.0)

    def pool2(x):
        N, H, W, C = x.shape
        return x.reshape(N, H // 2, 2, W // 2, 2, C).mean(axis=(2, 4))

    def dense(x, layers):
        for lp in layers:
            if "w2" in lp:
                t = conv1(bnrelu(x, lp["bn1"]), lp["w1"])
                y = conv3(bnrelu(t, lp["bn2"]), lp["w2"])
            else:
                y = conv3(bnrelu(x, lp["bn1"]), lp["w1"])
            x = jnp.concatenate([x, y], axis=-1)        # torch.cat((x, out), 1)
        return x

    x = conv3(x, params["conv1"])
    x = pool2(conv1(bnrelu(dense(x, params["dense1"]), params["trans1"]["bn"]),
                    params["trans1"]["w"]))
    x = pool2(conv1(bnrelu(dense(x, params["dense2"]), params["trans2"]["bn"]),
                    params["trans2"]["w"]))
    x = dense(x, params["dense3"])
    act = bnrelu(x, params["bn_final"])
    pooled = act.mean(axis=(1, 2))
    logits = jnp.dot(pooled, params["fc_w"], precision=P) + params["fc_b"]
    return jax.nn.log_softmax(logits, axis=-1)


# ----------------------------------------------------------------------------
if __name__ == "__main__":
    import numpy as np

    _get_roll_dir()     # resolve pltpu.roll's rotation convention outside jit

    configs = [
        # growthRate, depth, reduction, nClasses, bottleneck
        (4, 10, 0.5, 10, False),
        (4, 10, 0.5, 10, True),
    ]
    for growthRate, depth, reduction, nClasses, bottleneck in configs:
        key = jax.random.PRNGKey(0)
        k_param, k_x = jax.random.split(key)
        params = make_params(k_param, growthRate, depth, reduction, nClasses,
                             bottleneck)
        # PyTorch-style NCHW input; 32x32 so the final global pool is 8x8
        # exactly as hard-coded in the original module.
        x = jax.random.normal(k_x, (2, 3, 32, 32), jnp.float32)

        fwd = jax.jit(functools.partial(densenet_forward, bottleneck=bottleneck))
        out = jax.block_until_ready(fwd(x, params))
        ref = jax.block_until_ready(ref_forward(x, params, bottleneck))

        assert out.shape == (2, nClasses), out.shape
        # Kernel matmuls run on the bf16 MXU (f32 accumulation); reference is
        # full f32, so allow a correspondingly looser tolerance.
        np.testing.assert_allclose(np.asarray(out), np.asarray(ref),
                                   atol=5e-2, rtol=5e-2)
        # Rows must be valid log-probabilities.
        np.testing.assert_allclose(np.exp(np.asarray(out)).sum(-1), 1.0,
                                   atol=1e-3)
    print("KERNEL_OK")
</pallas_src>

<mosaic_0001>
module attributes {stable_mosaic.version = 11 : i64} {
  func.func @k(%arg0: memref<8x128xf32, #tpu.memory_space<vmem>>, %arg1: memref<8x128xf32, #tpu.memory_space<vmem>>) attributes {dimension_semantics = [], scalar_prefetch = 0 : i64, scratch_operands = 0 : i64, tpu.core_type = #tpu.core_type<tc>} {
    %c0 = arith.constant 0 : index
    %c0_0 = arith.constant 0 : index
    %0 = vector.load %arg0[%c0, %c0_0] : memref<8x128xf32, #tpu.memory_space<vmem>>, vector<8x128xf32>
    %c3_i32 = arith.constant 3 : i32
    %1 = tpu.dynamic_rotate %0 by %c3_i32 dim 1 : vector<8x128xf32>, i32 -> vector<8x128xf32>
    %c0_1 = arith.constant 0 : index
    %c0_2 = arith.constant 0 : index
    %2 = vector.load %arg1[%c0_1, %c0_2] : memref<8x128xf32, #tpu.memory_space<vmem>>, vector<8x128xf32>
    tpu.vector_store %arg1[%c0_1, %c0_2], %1 {strides = array<i32>} : memref<8x128xf32, #tpu.memory_space<vmem>>, vector<8x128xf32>,
    return
  }
}

</mosaic_0001>

<bundles_post_ra>
// kernel: tpu_custom_call.1
= control target key start
LH: loop header
LB: loop body
LE: loop exit
PB: predicated region body
PF: predicated region fallthrough
CT: control target
= control target key end

     0   :  { %6 = vsyncpa [#allocation3], 0  ;;  %s128_s0 = inlined_call_operand.hbm [shape: f32[8,128], index: 0, kind: input, shape index: {}]   ;;  %s129_s1 = inlined_call_operand.hbm [shape: f32[8,128], index: 1, kind: output, shape index: {}]  }
   0x1   :  { %7 = vsyncpa [#allocation4], 0  ;;  %s91_s6 = smov [#allocation2]   ;;  %s43_s10 = scalar_lea.hbm %s128_s0, 128 }
   0x2   :  { %s14_s7 = sshll.u32 %s91_s6, 4  ;;  %p44_p0 = scmp.ne.s32.totalorder %s128_s0, %s43_s10  ;;  %s15_s7 = int_to_ptr.vmem [resolvable:$true] %s14_s7 }
   0x3   :  { %p47_p1 = scmp.lt.u32.totalorder %s43_s10, %s128_s0 }
   0x5   :  { %p49_p2 = pnand %p47_p1, %p44_p0 }
   0x7   :  { %52 = shalt.err (!%p49_p2)
}
   0x8   :  { %s53_s15 = scalar_lea.vmem %s15_s7, 128  ;;  %p58_p4 = scmp.lt.s32.totalorder %s15_s7, %s15_s7 }
   0x9   :  { %p54_p3 = scmp.ne.s32.totalorder %s15_s7, %s53_s15  ;;  %p59_p5 = scmp.lt.s32.totalorder %s53_s15, %s53_s15 }
   0xb   :  { %p60_p6 = por %p59_p5, %p58_p4 }
   0xd   :  { %p61_p7 = pnand %p60_p6, %p54_p3 }
   0xf   :  { %64 = shalt.err (!%p61_p7)
}
  0x10   :  { %17 = dma.hbm_to_vmem [thread:$0]  %s128_s0, 128, %s15_s7, [#allocation3]  }
  0x11   :  { %87 = dma.done.wait [#allocation3], 128  }
  0x12   :  { %88 = vsyncadd [#allocation3], 4294967168  ;;  %v21_v0 = vld [vmem:[#allocation2] sm:$0xff]  ;;  %s92_s18 = smov 3   ;;  %s93_s19 = smov [#allocation5]  }
  0x13   :  { %22 = vrot.lane.b32.xlu0 %v21_v0, %s92_s18  ;;  %s31_s20 = sshll.u32 %s93_s19, 4  ;;  %s32_s20 = int_to_ptr.vmem [resolvable:$true] %s31_s20 }
  0x14   :  { %s65_s21 = scalar_lea.vmem %s32_s20, 128  ;;  %p70_p9 = scmp.lt.s32.totalorder %s32_s20, %s32_s20 }
  0x15   :  { %p66_p8 = scmp.ne.s32.totalorder %s32_s20, %s65_s21  ;;  %p71_p10 = scmp.lt.s32.totalorder %s65_s21, %s65_s21 }
  0x17   :  { %p72_p11 = por %p71_p10, %p70_p9 }
  0x19   :  { %p73_p12 = pnand %p72_p11, %p66_p8 }
  0x85   :  { %v23_v1 = vpop.permute.xlu0 %22 }
  0x86   :  { %24 = vst [vmem:[#allocation5] sm:$0xff] %v23_v1 }
  0x87   :  { %76 = shalt.err (!%p73_p12)
}
  0x88   :  { %s77_s0 = scalar_lea.hbm %s129_s1, 128 }
  0x89   :  { %p78_p13 = scmp.ne.s32.totalorder %s129_s1, %s77_s0  ;;  %p81_p0 = scmp.lt.u32.totalorder %s77_s0, %s129_s1 }
  0x8b   :  { %p83_p1 = pnand %p81_p0, %p78_p13 }
  0x8d   :  { %86 = shalt.err (!%p83_p1)
}
  0x8e   :  { %34 = dma.vmem_to_hbm [thread:$0]  %s32_s20, 128, %s129_s1, [#allocation4]  }
  0x8f   :  { %89 = dma.done.wait [#allocation4], 128  }
  0x90   :  { %90 = vsyncadd [#allocation4], 4294967168 }
  0x91   :  { %38 = vsyncpa [#allocation3], 1 }
  0x92   :  { %39 = vsyncpa [#allocation4], 1 }

</bundles_post_ra>
